<compile_context>
chip_gen: v7x
topology: tpu7x:2x2x1
jax: 0.10.0
libtpu: 0.0.40
codegen_flags: <defaults>
</compile_context>

<pallas_src>
import math

import jax
import jax.numpy as jnp
from jax import lax
from jax.experimental import pallas as pl
from jax.experimental.pallas import tpu as pltpu


def _mlp_kernel(x_ref, wfc_ref, bfc_ref, wproj_ref, bproj_ref, o_ref, acc_ref):
    # x_ref:     (tm, H)
    # wfc_ref:   (H, ti)    bfc_ref:   (1, ti)
    # wproj_ref: (ti, H)    bproj_ref: (1, H)
    # o_ref:     (tm, H)    acc_ref:   (tm, H) f32 scratch
    j = pl.program_id(1)

    @pl.when(j == 0)
    def _init():
        acc_ref[...] = jnp.zeros_like(acc_ref)

    # c_fc slice: x @ W_fc[:, j*ti:(j+1)*ti] + b_fc[j*ti:(j+1)*ti]
    x = x_ref[...].astype(wfc_ref.dtype)  # bf16 MXU path if weights are bf16
    h = jnp.dot(x, wfc_ref[...], preferred_element_type=jnp.float32)
    h = h + bfc_ref[...].astype(jnp.float32)

    # Exact (erf-based) GELU in f32 — matches torch.nn.functional.gelu default.
    inv_sqrt2 = jnp.float32(1.0 / math.sqrt(2.0))
    h = 0.5 * h * (1.0 + lax.erf(h * inv_sqrt2))

    # c_proj partial product, accumulate in f32 VMEM scratch.
    h = h.astype(wproj_ref.dtype)
    acc_ref[...] += jnp.dot(h, wproj_ref[...], preferred_element_type=jnp.float32)

    @pl.when(j == pl.num_programs(1) - 1)
    def _finalize():
        out = acc_ref[...] + bproj_ref[...].astype(jnp.float32)
        # Dropout (eval mode) == identity.
        o_ref[...] = out.astype(o_ref.dtype)


def _round_up(n, m):
    return ((n + m - 1) // m) * m


def _pick_ti(intermediate):
    for cand in (2048, 1024, 512, 256, 128):
        if intermediate % cand == 0:
            return cand
    return intermediate  # small / irregular I: single reduction step


def gpt_neo_mlp(x, w_fc, b_fc, w_proj, b_proj, *, max_tm=512):
    """x: [..., H] -> [..., H]  (GPTNeoMLP forward, dropout disabled)."""
    orig_shape = x.shape
    H = x.shape[-1]
    I = w_fc.shape[-1]

    x2d = x.reshape(-1, H)
    M = x2d.shape[0]

    # Row tile: large (feeds the MXU), multiple of 8, ragged M via zero pad.
    tm = min(max_tm, _round_up(M, 8))
    M_pad = _round_up(M, tm)
    if M_pad != M:
        x2d = jnp.pad(x2d, ((0, M_pad - M), (0, 0)))

    # Intermediate-dim tile: keeps VMEM use independent of I.
    ti = _pick_ti(I)
    n_i = I // ti

    # Biases as (1, N) so they broadcast cleanly over the row tile in-kernel.
    b_fc2 = b_fc.reshape(1, I)
    b_proj2 = b_proj.reshape(1, H)

    # VMEM budget: double-buffered input/output tiles + f32 accumulator.
    def nbytes(shape, dt):
        n = 1
        for s in shape:
            n *= s
        return n * jnp.dtype(dt).itemsize

    est = 2 * (
        nbytes((tm, H), x.dtype)
        + nbytes((H, ti), w_fc.dtype)
        + nbytes((1, ti), b_fc.dtype)
        + nbytes((ti, H), w_proj.dtype)
        + nbytes((1, H), b_proj.dtype)
        + nbytes((tm, H), x.dtype)
    ) + nbytes((tm, H), jnp.float32)
    vmem_limit = int(min(64 << 20, max(32 << 20, (est * 5) // 4)))

    cost = pl.CostEstimate(
        flops=4 * M_pad * H * I,          # two matmuls
        transcendentals=M_pad * I,        # erf per intermediate element
        bytes_accessed=(
            nbytes((M_pad, H), x.dtype)
            + nbytes((H, I), w_fc.dtype)
            + nbytes((I, H), w_proj.dtype)
            + nbytes((I,), b_fc.dtype)
            + nbytes((H,), b_proj.dtype)
            + nbytes((M_pad, H), x.dtype)
        ),
    )

    out2d = pl.pallas_call(
        _mlp_kernel,
        out_shape=jax.ShapeDtypeStruct((M_pad, H), x.dtype),
        grid_spec=pltpu.PrefetchScalarGridSpec(
            num_scalar_prefetch=0,
            grid=(M_pad // tm, n_i),              # reduction (I) axis last
            in_specs=[
                pl.BlockSpec((tm, H), lambda i, j: (i, 0)),   # x tile (resident over j)
                pl.BlockSpec((H, ti), lambda i, j: (0, j)),   # w_fc column tile
                pl.BlockSpec((1, ti), lambda i, j: (0, j)),   # b_fc tile
                pl.BlockSpec((ti, H), lambda i, j: (j, 0)),   # w_proj row tile
                pl.BlockSpec((1, H), lambda i, j: (0, 0)),    # b_proj
            ],
            out_specs=pl.BlockSpec((tm, H), lambda i, j: (i, 0)),
            scratch_shapes=[pltpu.VMEM((tm, H), jnp.float32)],
        ),
        compiler_params=pltpu.CompilerParams(
            dimension_semantics=("parallel", "arbitrary"),
            vmem_limit_bytes=vmem_limit,
        ),
        cost_estimate=cost,
    )(x2d, w_fc, b_fc2, w_proj, b_proj2)

    return out2d[:M].reshape(orig_shape)


def _reference_mlp(x, w_fc, b_fc, w_proj, b_proj):
    h = x @ w_fc + b_fc
    h = 0.5 * h * (1.0 + lax.erf(h / jnp.sqrt(2.0)))
    return h @ w_proj + b_proj


if __name__ == "__main__":
    # Config analogous to GPTNeoConfig: hidden_size=32, intermediate=4*hidden.
    batch, seq, hidden = 2, 8, 32
    intermediate = 4 * hidden  # 128

    key = jax.random.PRNGKey(0)
    k_x, k_wfc, k_bfc, k_wproj, k_bproj = jax.random.split(key, 5)

    x = jax.random.normal(k_x, (batch, seq, hidden), dtype=jnp.float32)
    # Deterministic parameter init (synthetic; shapes match nn.Linear params,
    # stored transposed for row-major matmul).  For production, pass bf16
    # weights to hit the bf16 MXU path; f32 here so the check is exact-ish.
    w_fc = jax.random.normal(k_wfc, (hidden, intermediate), jnp.float32) * 0.02
    b_fc = jax.random.normal(k_bfc, (intermediate,), jnp.float32) * 0.02
    w_proj = jax.random.normal(k_wproj, (intermediate, hidden), jnp.float32) * 0.02
    b_proj = jax.random.normal(k_bproj, (hidden,), jnp.float32) * 0.02

    out = gpt_neo_mlp(x, w_fc, b_fc, w_proj, b_proj)
    out = jax.block_until_ready(out)

    ref = _reference_mlp(x, w_fc, b_fc, w_proj, b_proj)
    assert out.shape == (batch, seq, hidden)
    assert jnp.allclose(out, ref, atol=1e-5, rtol=1e-5)

    print("KERNEL_OK")
</pallas_src>

<mosaic_0001>
module attributes {stable_mosaic.version = 11 : i64} {
  func.func @_mlp_kernel(%arg0: i32, %arg1: i32, %arg2: memref<16x32xf32, #tpu.memory_space<vmem>>, %arg3: memref<32x128xf32, #tpu.memory_space<vmem>>, %arg4: memref<1x128xf32, #tpu.memory_space<vmem>>, %arg5: memref<128x32xf32, #tpu.memory_space<vmem>>, %arg6: memref<1x32xf32, #tpu.memory_space<vmem>>, %arg7: memref<16x32xf32, #tpu.memory_space<vmem>>, %arg8: memref<16x32xf32, #tpu.memory_space<vmem>>) attributes {dimension_semantics = [#tpu.dimension_semantics<parallel>, #tpu.dimension_semantics<arbitrary>], iteration_bounds = array<i64: 1, 1>, scalar_prefetch = 0 : i64, scratch_operands = 1 : i64, tpu.core_type = #tpu.core_type<tc>, window_params = [{transform_indices = @transform_0, window_bounds = array<i64: 16, 32>}, {transform_indices = @transform_1, window_bounds = array<i64: 32, 128>}, {transform_indices = @transform_2, window_bounds = array<i64: 1, 128>}, {transform_indices = @transform_3, window_bounds = array<i64: 128, 32>}, {pipeline_mode = #tpu.pipeline_mode<synchronous>, transform_indices = @transform_4, window_bounds = array<i64: 1, 32>}, {transform_indices = @transform_5, window_bounds = array<i64: 16, 32>}]} {
    %c0_i32 = arith.constant 0 : i32
    %0 = arith.cmpi eq, %arg1, %c0_i32 : i32
    %1 = arith.extui %0 : i1 to i32
    %c0_i32_0 = arith.constant 0 : i32
    %2 = arith.cmpi ne, %1, %c0_i32_0 : i32
    scf.if %2 {
      %cst_18 = arith.constant 0.000000e+00 : f32
      %25 = vector.broadcast %cst_18 : f32 to vector<16x32xf32>
      %c0_19 = arith.constant 0 : index
      %c0_20 = arith.constant 0 : index
      %26 = vector.load %arg8[%c0_19, %c0_20] : memref<16x32xf32, #tpu.memory_space<vmem>>, vector<16x32xf32>
      tpu.vector_store %arg8[%c0_19, %c0_20], %25 {strides = array<i32>} : memref<16x32xf32, #tpu.memory_space<vmem>>, vector<16x32xf32>,
    } else {
    }
    %c0 = arith.constant 0 : index
    %c0_1 = arith.constant 0 : index
    %3 = vector.load %arg2[%c0, %c0_1] : memref<16x32xf32, #tpu.memory_space<vmem>>, vector<16x32xf32>
    %c0_2 = arith.constant 0 : index
    %c0_3 = arith.constant 0 : index
    %4 = vector.load %arg3[%c0_2, %c0_3] : memref<32x128xf32, #tpu.memory_space<vmem>>, vector<32x128xf32>
    %cst = arith.constant dense<0.000000e+00> : vector<16x128xf32>
    %5 = tpu.matmul %3, %4, %cst {dimension_numbers = #tpu.dot_dimension_numbers<[1], [0], [0], [1], [0, 0, 1, 1], [], []>} : vector<16x32xf32>, vector<32x128xf32>, vector<16x128xf32> -> vector<16x128xf32>
    %c0_4 = arith.constant 0 : index
    %c0_5 = arith.constant 0 : index
    %6 = vector.load %arg4[%c0_4, %c0_5] : memref<1x128xf32, #tpu.memory_space<vmem>>, vector<1x128xf32>
    %7 = vector.broadcast %6 : vector<1x128xf32> to vector<16x128xf32>
    %8 = arith.addf %5, %7 : vector<16x128xf32>
    %cst_6 = arith.constant 5.000000e-01 : f32
    %9 = vector.broadcast %cst_6 : f32 to vector<16x128xf32>
    %10 = arith.mulf %9, %8 : vector<16x128xf32>
    %cst_7 = arith.constant 0.707106769 : f32
    %11 = vector.broadcast %cst_7 : f32 to vector<16x128xf32>
    %12 = arith.mulf %8, %11 : vector<16x128xf32>
    %13 = math.erf %12 : vector<16x128xf32>
    %cst_8 = arith.constant 1.000000e+00 : f32
    %14 = vector.broadcast %cst_8 : f32 to vector<16x128xf32>
    %15 = arith.addf %14, %13 : vector<16x128xf32>
    %16 = arith.mulf %10, %15 : vector<16x128xf32>
    %c0_9 = arith.constant 0 : index
    %c0_10 = arith.constant 0 : index
    %17 = vector.load %arg8[%c0_9, %c0_10] : memref<16x32xf32, #tpu.memory_space<vmem>>, vector<16x32xf32>
    %c0_11 = arith.constant 0 : index
    %c0_12 = arith.constant 0 : index
    %18 = vector.load %arg5[%c0_11, %c0_12] : memref<128x32xf32, #tpu.memory_space<vmem>>, vector<128x32xf32>
    %cst_13 = arith.constant dense<0.000000e+00> : vector<16x32xf32>
    %19 = tpu.matmul %16, %18, %cst_13 {dimension_numbers = #tpu.dot_dimension_numbers<[1], [0], [0], [1], [0, 0, 1, 1], [], []>} : vector<16x128xf32>, vector<128x32xf32>, vector<16x32xf32> -> vector<16x32xf32>
    %20 = arith.addf %17, %19 : vector<16x32xf32>
    %c0_14 = arith.constant 0 : index
    %c0_15 = arith.constant 0 : index
    %21 = vector.load %arg8[%c0_14, %c0_15] : memref<16x32xf32, #tpu.memory_space<vmem>>, vector<16x32xf32>
    tpu.vector_store %arg8[%c0_14, %c0_15], %20 {strides = array<i32>} : memref<16x32xf32, #tpu.memory_space<vmem>>, vector<16x32xf32>,
    %c0_i32_16 = arith.constant 0 : i32
    %22 = arith.cmpi eq, %arg1, %c0_i32_16 : i32
    %23 = arith.extui %22 : i1 to i32
    %c0_i32_17 = arith.constant 0 : i32
    %24 = arith.cmpi ne, %23, %c0_i32_17 : i32
    scf.if %24 {
      %c0_18 = arith.constant 0 : index
      %c0_19 = arith.constant 0 : index
      %25 = vector.load %arg8[%c0_18, %c0_19] : memref<16x32xf32, #tpu.memory_space<vmem>>, vector<16x32xf32>
      %c0_20 = arith.constant 0 : index
      %c0_21 = arith.constant 0 : index
      %26 = vector.load %arg6[%c0_20, %c0_21] : memref<1x32xf32, #tpu.memory_space<vmem>>, vector<1x32xf32>
      %27 = vector.broadcast %26 : vector<1x32xf32> to vector<16x32xf32>
      %28 = arith.addf %25, %27 : vector<16x32xf32>
      %c0_22 = arith.constant 0 : index
      %c0_23 = arith.constant 0 : index
      %29 = vector.load %arg7[%c0_22, %c0_23] : memref<16x32xf32, #tpu.memory_space<vmem>>, vector<16x32xf32>
      tpu.vector_store %arg7[%c0_22, %c0_23], %28 {strides = array<i32>} : memref<16x32xf32, #tpu.memory_space<vmem>>, vector<16x32xf32>,
    } else {
    }
    return
  }
  func.func @transform_0(%arg0: i32, %arg1: i32) -> (i32, i32) {
    %c0_i32 = arith.constant 0 : i32
    %c0_i32_0 = arith.constant 0 : i32
    return %arg0, %c0_i32 : i32, i32
  }
  func.func @transform_1(%arg0: i32, %arg1: i32) -> (i32, i32) {
    %c0_i32 = arith.constant 0 : i32
    %c0_i32_0 = arith.constant 0 : i32
    return %c0_i32, %arg1 : i32, i32
  }
  func.func @transform_2(%arg0: i32, %arg1: i32) -> (i32, i32) {
    %c0_i32 = arith.constant 0 : i32
    %c0_i32_0 = arith.constant 0 : i32
    return %c0_i32, %arg1 : i32, i32
  }
  func.func @transform_3(%arg0: i32, %arg1: i32) -> (i32, i32) {
    %c0_i32 = arith.constant 0 : i32
    %c0_i32_0 = arith.constant 0 : i32
    return %arg1, %c0_i32 : i32, i32
  }
  func.func @transform_4(%arg0: i32, %arg1: i32) -> (i32, i32) {
    %c0_i32 = arith.constant 0 : i32
    %c0_i32_0 = arith.constant 0 : i32
    %c0_i32_1 = arith.constant 0 : i32
    return %c0_i32, %c0_i32_0 : i32, i32
  }
  func.func @transform_5(%arg0: i32, %arg1: i32) -> (i32, i32) {
    %c0_i32 = arith.constant 0 : i32
    %c0_i32_0 = arith.constant 0 : i32
    return %arg0, %c0_i32 : i32, i32
  }
}

</mosaic_0001>

<bundles_post_ra>
// kernel: tpu_custom_call.1
= control target key start
LH: loop header
LB: loop body
LE: loop exit
PB: predicated region body
PF: predicated region fallthrough
CT: control target
= control target key end

     0   :  { %vm25_vm0 = vcmask 261120   ;;  %s534_s0 = inlined_call_operand.vmem [shape: f32[16,32], index: 0, kind: input, shape index: {}]   ;;  %s535_s1 = inlined_call_operand.vmem [shape: f32[32,128], index: 1, kind: input, shape index: {}]   ;;  %s536_s2 = inlined_call_operand.vmem [shape: f32[1,128], index: 2, kind: input, shape index: {}]   ;;  %s537_s3 = inlined_call_operand.vmem [shape: f32[128,32], index: 3, kind: input, shape index: {}]   ;;  %s538_s4 = inlined_call_operand.vmem [shape: f32[1,32], index: 4, kind: input, shape index: {}]   ;;  %s539_s5 = inlined_call_operand.hbm [shape: f32[16,32], index: 5, kind: output, shape index: {}]  }
   0x1   :  { %v30_v0 = vld [vmem:[%s535_s1] sm:$0xff]  ;;  %v31_v1 = vld [vmem:[%s535_s1 + $0x8] sm:$0xff]  ;;  %v32_v2 = vld [vmem:[%s535_s1 + $0x10] sm:$0xff] }
   0x2   :  { %v336_v3 = vpack.c.bf16 %v31_v1, %v30_v0  ;;  %v33_v4 = vld [vmem:[%s535_s1 + $0x18] sm:$0xff]  ;;  %v28_v5 = vld [vmem:[%s534_s0] sm:$0xff]  ;;  %v136_v8 = vld [vmem:[%s537_s3 + $0x8] sm:$0xff] }
   0x3   :  { %v340_v6 = vpack.c.bf16 %v33_v4, %v32_v2  ;;  %298 = vmatprep.mubr.msk.f32.mxu0 %vm25_vm0, %v28_v5  ;;  %v135_v7 = vld [vmem:[%s537_s3] sm:$0xff]  ;;  %v137_v9 = vld [vmem:[%s537_s3 + $0x10] sm:$0xff]  ;;  %v138_v11 = vld [vmem:[%s537_s3 + $0x18] sm:$0xff] }
   0x4   :  { %337 = vmatprep.subr.bf16.mxu0 %v336_v3  ;;  %v344_v10 = vpack.c.bf16 %v136_v8, %v135_v7  ;;  %v348_v12 = vpack.c.bf16 %v138_v11, %v137_v9  ;;  %v139_v13 = vld [vmem:[%s537_s3 + $0x20] sm:$0xff]  ;;  %v140_v14 = vld [vmem:[%s537_s3 + $0x28] sm:$0xff] }
   0x5   :  { %339 = vmatpush3.bf16.msra.mxu0 %v336_v3 }
   0x6   :  { %10 = vsyncpa [#allocation4], 0  ;;  %341 = vmatprep.subr.bf16.mxu0 %v340_v6  ;;  %345 = vmatprep.subr.bf16.mxu1 %v344_v10  ;;  %v352_v15 = vpack.c.bf16 %v140_v14, %v139_v13  ;;  %v29_v16 = vld [vmem:[%s534_s0 + $0x8] sm:$0xff]  ;;  %v141_v17 = vld [vmem:[%s537_s3 + $0x30] sm:$0xff]  ;;  %v408_v32 = vmov 0.0   ;;  %s409_s11 = smov [#allocation3]  }
   0x7   :  { %347 = vmatpush3.bf16.msra.mxu1 %v344_v10  ;;  %v142_v18 = vld [vmem:[%s537_s3 + $0x38] sm:$0xff]  ;;  %v143_v20 = vld [vmem:[%s537_s3 + $0x40] sm:$0xff]  ;;  %v144_v21 = vld [vmem:[%s537_s3 + $0x48] sm:$0xff]  ;;  %27 = vst.msk [vmem:[#allocation2 + $0x8] sm:$0xff] %vm25_vm0, %v408_v32  ;;  %s251_s12 = sshll.u32 %s409_s11, 4  ;;  %s252_s12 = int_to_ptr.vmem [resolvable:$true] %s251_s12 }
   0x8   :  { %349 = vmatprep.subr.bf16.mxu1 %v348_v12  ;;  %v356_v19 = vpack.c.bf16 %v142_v18, %v141_v17  ;;  %v360_v22 = vpack.c.bf16 %v144_v21, %v143_v20  ;;  %v145_v23 = vld [vmem:[%s537_s3 + $0x50] sm:$0xff]  ;;  %v146_v24 = vld [vmem:[%s537_s3 + $0x58] sm:$0xff]  ;;  %v147_v26 = vld [vmem:[%s537_s3 + $0x60] sm:$0xff]  ;;  %26 = vst.msk [vmem:[#allocation2] sm:$0xff] %vm25_vm0, %v408_v32  ;;  %s384_s13 = scalar_lea.vmem %s252_s12, 256  ;;  %p389_p1 = scmp.lt.s32.totalorder %s252_s12, %s252_s12 }
   0x9   :  { %343 = vmatpush3.bf16.msra.mxu0 %v340_v6  ;;  %v364_v25 = vpack.c.bf16 %v146_v24, %v145_v23  ;;  %v148_v27 = vld [vmem:[%s537_s3 + $0x68] sm:$0xff]  ;;  %v149_v29 = vld [vmem:[%s537_s3 + $0x70] sm:$0xff]  ;;  %v150_v30 = vld [vmem:[%s537_s3 + $0x78] sm:$0xff]  ;;  %p385_p0 = scmp.ne.s32.totalorder %s252_s12, %s384_s13  ;;  %p390_p2 = scmp.lt.s32.totalorder %s384_s13, %s384_s13 }
   0xa   :  { %v368_v28 = vpack.c.bf16 %v148_v27, %v147_v26  ;;  %v372_v31 = vpack.c.bf16 %v150_v30, %v149_v29  ;;  %v262_v33 = vld [vmem:[%s536_s2] ss:$0 sm:$0xff] }
   0xb   :  { %351 = vmatpush3.bf16.msra.mxu1 %v348_v12  ;;  %v265_v54 = vld [vmem:[%s538_s4] ss:$0 sm:$0xff]  ;;  %p391_p3 = por %p390_p2, %p389_p1 }
   0xc   :  { %299 = vmatmul.mubr.msk.f32.vlgmr.msra.gmra.mrb[0].mxu0 %vm25_vm0, %v29_v16  ;;  %353 = vmatprep.subr.bf16.mxu1 %v352_v15 }
   0xd   :  { %p392_p4 = pnand %p391_p3, %p385_p0 }
   0xe   :  { %v134_v48 = vld [vmem:[#allocation2 + $0x8] sm:$0xff] }
   0xf   :  { %355 = vmatpush3.bf16.msra.mxu1 %v352_v15  ;;  %v133_v49 = vld [vmem:[#allocation2] sm:$0xff] }
  0x10   :  { %357 = vmatprep.subr.bf16.mxu1 %v356_v19 }
  0x13   :  { %359 = vmatpush3.bf16.msra.mxu1 %v356_v19 }
  0x14   :  { %361 = vmatprep.subr.bf16.mxu1 %v360_v22 }
  0x17   :  { %363 = vmatpush3.bf16.msra.mxu1 %v360_v22 }
  0x18   :  { %365 = vmatprep.subr.bf16.mxu1 %v364_v25 }
  0x1b   :  { %367 = vmatpush3.bf16.msra.mxu1 %v364_v25 }
  0x1c   :  { %369 = vmatprep.subr.bf16.mxu1 %v368_v28 }
  0x1f   :  { %371 = vmatpush3.bf16.msra.mxu1 %v368_v28 }
  0x20   :  { %373 = vmatprep.subr.bf16.mxu1 %v372_v31 }
  0x23   :  { %375 = vmatpush3.bf16.msra.mxu1 %v372_v31 }
  0xdf   :  { %v300_v34 = vpop.f32.mrb[0].mxu0 }
  0xe0   :  { %v120_v35 = vadd.f32 %v300_v34, %v262_v33  ;;  %v114_v36 = vpop.f32.mrb[1].mxu0 }
  0xe1   :  { %v115_v37 = vadd.f32 %v262_v33, %v114_v36 }
  0xe2   :  { %v126_v38 = vmul.f32 0.70710677, %v120_v35  ;;  %v124_v45 = vmul.f32 0.5, %v120_v35 }
  0xe3   :  { %v125_v39 = vmul.f32 0.70710677, %v115_v37  ;;  %v123_v43 = vmul.f32 0.5, %v115_v37 }
  0xe4   :  { %380 = verf.f32 %v126_v38 }
  0xe5   :  { %382 = verf.f32 %v125_v39 }
  0xee   :  { %v381_v40 = vpop.eup %380 }
  0xef   :  { %v383_v41 = vpop.eup %382  ;;  %v130_v42 = vadd.f32 1.0, %v381_v40 }
  0xf0   :  { %v129_v44 = vadd.f32 1.0, %v383_v41 }
  0xf1   :  { %v132_v47 = vmul.f32 %v130_v42, %v124_v45 }
  0xf2   :  { %v131_v46 = vmul.f32 %v129_v44, %v123_v43 }
  0xf4   :  { %333 = vmatprep.mubr.f32.mxu1 %v131_v46 }
  0xf5   :  { %334 = vmatmul.mubr.f32.vlgmr.msra.gmra.mrb[0].mxu1 %v132_v47 }
 0x1c8   :  { %v335_v50 = vpop.f32.mrb[0].mxu1 }
 0x1c9   :  { %v227_v51 = vadd.f32 %v335_v50, %v134_v48  ;;  %v217_v52 = vpop.f32.mrb[1].mxu1 }
 0x1ca   :  { %v226_v53 = vadd.f32 %v217_v52, %v133_v49 }
 0x1cb   :  { %229 = vst.msk [vmem:[#allocation2 + $0x8] sm:$0xff] %vm25_vm0, %v227_v51 }
 0x1cc   :  { %228 = vst.msk [vmem:[#allocation2] sm:$0xff] %vm25_vm0, %v226_v53 }
 0x1d2   :  { %v234_v55 = vld [vmem:[#allocation2 + $0x8] sm:$0xff] }
 0x1d3   :  { %v233_v56 = vld [vmem:[#allocation2] sm:$0xff]  ;;  %v243_v57 = vadd.f32 %v265_v54, %v234_v55 }
 0x1d4   :  { %v242_v58 = vadd.f32 %v265_v54, %v233_v56 }
 0x1d5   :  { %245 = vst.msk [vmem:[#allocation3 + $0x8] sm:$0xff] %vm25_vm0, %v243_v57 }
 0x1d6   :  { %244 = vst.msk [vmem:[#allocation3] sm:$0xff] %vm25_vm0, %v242_v58 }
 0x1d7   :  { %395 = shalt.err (!%p392_p4)
}
 0x1d8   :  { %s396_s15 = scalar_lea.hbm %s539_s5, 256 }
 0x1d9   :  { %p397_p5 = scmp.ne.s32.totalorder %s539_s5, %s396_s15  ;;  %p400_p6 = scmp.lt.u32.totalorder %s396_s15, %s539_s5 }
 0x1db   :  { %p402_p7 = pnand %p400_p6, %p397_p5 }
 0x1dd   :  { %405 = shalt.err (!%p402_p7)
}
 0x1de   :  { %s410_s20 = smov 128   ;;  %s411_s21 = smov 8  }
 0x1df   :  { %257 = dma.vmem_to_hbm [thread:$0]  %s252_s12, 256, %s539_s5, [#allocation4], %s410_s20, %s410_s20, %s411_s21  }
 0x1e0   :  { %406 = dma.done.wait [#allocation4], 256  }
 0x1e1   :  { %407 = vsyncadd [#allocation4], 4294967040 }
 0x1e2   :  { %261 = vsyncpa [#allocation4], 1 }

</bundles_post_ra>
